<compile_context>
chip_gen: v5e
topology: v5e:2x2
jax: 0.10.0
libtpu: 0.0.40
codegen_flags: <defaults>
</compile_context>

<pallas_src>
import functools
from typing import List

import numpy as np
import jax
import jax.numpy as jnp
from jax import lax
from jax.experimental import pallas as pl
from jax.experimental.pallas import tpu as pltpu


def _round_up(n: int, m: int) -> int:
    return ((n + m - 1) // m) * m


def _vmem_budget_bytes() -> int:
    # v7x: 64 MiB VMEM per TensorCore; v5e/v6e: 128 MiB.  Keep headroom for
    # double-buffered I/O + compiler scratch.
    try:
        cap = int(getattr(pltpu.get_tpu_info(), "vmem_capacity_bytes", 0))
    except Exception:
        cap = 0
    if cap >= 96 * 1024 * 1024:
        return 64 * 1024 * 1024          # v5e / v6e: exploit the bigger VMEM
    return 48 * 1024 * 1024              # v7x-safe default


# ----------------------------------------------------------------------------- kernel

def wot_sinkhorn_kernel(xT_ref, y_ref, mu_ref, nu_ref, align_ref, cost_ref,
                        *, eps: float, max_iter: int, thresh: float,
                        check_every: int):
    # xT : (B, D, Nc) context embeddings (transposed)   mu : (B, 1, Nc)
    # y  : (B, Nt, D) trigger embeddings (row 0 = null) nu : (B, Nt, 1)
    xT = xT_ref[...]
    y = y_ref[...]
    mu = mu_ref[...]
    nu = nu_ref[...]

    Bv, Ntv, Dv = y.shape
    Ncv = xT.shape[2]
    inv_eps = 1.0 / eps

    # --- scaled, transposed squared-L2 cost: Ke[b,t,c] = -||y[b,t]-x[b,c]||^2/eps ---
    # triggers (small) on sublanes, 128-padded context on lanes; RHS already in
    # (K, N) orientation so no in-kernel relayout of x.
    xy = jnp.einsum('btd,bdc->btc', y, xT, preferred_element_type=jnp.float32)
    xx = jnp.sum(xT * xT, axis=1, keepdims=True)                 # (B, 1, Nc) sublane reduce
    yy = jnp.sum(y * y, axis=-1, keepdims=True)                  # (B, Nt, 1) lane reduce
    Ke = jnp.minimum((2.0 * xy - xx - yy) * inv_eps, 0.0)        # only -C/eps stays live

    valid_c = (mu > 0.0).astype(jnp.float32)                     # padded-context mask
    mu_eff = jnp.where(mu > 0.0, mu + 1e-8, 0.0)                 # exp(log_mu); 0 kills padding
    log_mu = jnp.where(mu > 0.0, jnp.log(mu + 1e-8), -1e9)       # (B, 1, Nc)
    log_nu = jnp.where(nu > 0.0, jnp.log(nu + 1e-8), -1e9)       # (B, Nt, 1)

    any_valid = (jnp.sum(valid_c, axis=2, keepdims=True) > 0.0).astype(jnp.float32)
    denom = jnp.maximum(jnp.sum(any_valid), 1.0)                 # #real examples in block

    # Hoisted 1/eps: iterate on u' = u/eps, v' = v/eps.
    def one_iter(_, carry):
        u, v, _ = carry
        u_prev = u
        A = Ke + u + v                                           # (B, Nt, Nc)
        mx = jnp.max(A, axis=1, keepdims=True)                   # (B, 1, Nc)
        P = jnp.exp(A - mx)                                      # the ONLY full-size exp
        S1 = jnp.sum(P, axis=1, keepdims=True)                   # (B, 1, Nc), >= 1
        u = log_mu - (jnp.log(S1) + mx) + u                      # trigger-axis lse
        # Context-axis lse without re-exponentiating:
        #   exp(M(u_new, v)) = P * exp(log_mu - log S1) = P * mu_eff / S1
        R = mu_eff * pl.reciprocal(S1, approx=True)              # (B, 1, Nc)
        S2 = jnp.sum(P * R, axis=2, keepdims=True)               # (B, Nt, 1)
        v = log_nu - jnp.log(jnp.maximum(S2, 1e-35)) + v         # floor guards padded rows
        return u, v, u_prev

    def cond(state):
        it, err, _, _ = state
        return jnp.logical_and(it < max_iter, err >= thresh)

    def body(state):
        it, _, u, v = state
        u, v, u_prev = lax.fori_loop(0, check_every, one_iter, (u, v, u),
                                     unroll=True)
        # reference criterion |u - u_prev|.sum(-1).mean() on the last update; u = eps*u'
        delta = jnp.abs(u - u_prev) * valid_c
        err = eps * jnp.sum(delta) / denom
        return it + check_every, err, u, v

    u0 = jnp.zeros((Bv, 1, Ncv), jnp.float32)
    v0 = jnp.zeros((Bv, Ntv, 1), jnp.float32)
    _, _, u, v = lax.while_loop(cond, body,
                                (jnp.int32(0), jnp.float32(1e30), u0, v0))

    pi = jnp.exp(Ke + u + v)                                     # transport plan (B,Nt,Nc)

    # per-example OT cost  <pi, C> = -eps * <pi, Ke>  -> (B, 1, 1)
    pc = pi * Ke
    cost_ref[...] = (-eps) * jnp.sum(jnp.sum(pc, axis=2, keepdims=True),
                                     axis=1, keepdims=True)

    # argmax over triggers for every context position == torch.max(pi, dim=2)[1]
    mxp = jnp.max(pi, axis=1, keepdims=True)                     # (B, 1, Nc)
    t_iota = lax.broadcasted_iota(jnp.int32, pi.shape, 1)        # (B, Nt, Nc)
    first = jnp.min(jnp.where(pi >= mxp, t_iota, jnp.int32(Ntv)),
                    axis=1, keepdims=True)                       # first max index
    align_ref[...] = first.astype(jnp.int32)                     # (B, 1, Nc)


def run_sinkhorn(context_emb_t, trigger_emb, ctx_marg, trig_marg, *,
                 eps: float = 0.1, max_iter: int = 100, thresh: float = 0.1,
                 check_every: int = 4, batch_block: int = 128):
    """context_emb_t: (bs, D, Nc), trigger_emb: (bs, Nt, D),
       ctx_marg: (bs, Nc), trig_marg: (bs, Nt).
       Returns (per-example OT cost (bs,), alignment argmax (bs, Nc) int32)."""
    bs, D, Nc = context_emb_t.shape
    Nt = trigger_emb.shape[1]
    budget = _vmem_budget_bytes()

    # Corrected VMEM estimate: loop-live full-size tensors (Ke, A/P temps, pi)
    # + double-buffered I/O tiles + small (B,1,Nc)/(B,Nt,1) state.
    def vmem_est(b):
        io = 2 * b * (D * Nc + Nt * D + Nc + Nt + Nc + 1) * 4
        loop = 6 * b * Nt * Nc * 4
        small = 10 * b * (Nc + Nt) * 4
        return io + loop + small

    B = max(1, min(batch_block, bs))
    while B > 1 and vmem_est(B) > budget - 4 * 1024 * 1024:
        B //= 2
    # v7x megacore: the "parallel" batch axis only uses both TensorCores if the
    # grid has >= 2 steps.
    if bs >= 2 and ((bs + B - 1) // B) < 2:
        B = max(1, (bs + 1) // 2)
    bs_pad = _round_up(bs, B)

    def pad_b(a):
        return jnp.pad(a, [(0, bs_pad - bs)] + [(0, 0)] * (a.ndim - 1))

    x = pad_b(context_emb_t.astype(jnp.float32))                 # (bs_pad, D, Nc)
    y = pad_b(trigger_emb.astype(jnp.float32))                   # (bs_pad, Nt, D)
    mu = pad_b(ctx_marg.astype(jnp.float32))[:, None, :]         # (bs_pad, 1, Nc)
    nu = pad_b(trig_marg.astype(jnp.float32))[:, :, None]        # (bs_pad, Nt, 1)

    kernel = functools.partial(wot_sinkhorn_kernel, eps=eps, max_iter=max_iter,
                               thresh=thresh, check_every=check_every)

    align, cost_pb = pl.pallas_call(
        kernel,
        out_shape=(
            jax.ShapeDtypeStruct((bs_pad, 1, Nc), jnp.int32),    # argmax alignment
            jax.ShapeDtypeStruct((bs_pad, 1, 1), jnp.float32),   # per-example OT cost
        ),
        grid_spec=pltpu.PrefetchScalarGridSpec(
            num_scalar_prefetch=0,
            grid=(bs_pad // B,),
            in_specs=[
                pl.BlockSpec((B, D, Nc), lambda i: (i, 0, 0)),
                pl.BlockSpec((B, Nt, D), lambda i: (i, 0, 0)),
                pl.BlockSpec((B, 1, Nc), lambda i: (i, 0, 0)),
                pl.BlockSpec((B, Nt, 1), lambda i: (i, 0, 0)),
            ],
            out_specs=[
                pl.BlockSpec((B, 1, Nc), lambda i: (i, 0, 0)),
                pl.BlockSpec((B, 1, 1), lambda i: (i, 0, 0)),
            ],
        ),
        compiler_params=pltpu.CompilerParams(
            dimension_semantics=("parallel",),                   # independent examples
            vmem_limit_bytes=budget),
    )(x, y, mu, nu)

    return cost_pb.reshape(bs_pad)[:bs], align[:bs, 0, :]


# ------------------------------------------------------------------------ host glue

def _np_softmax(x):
    x = x - np.max(x)
    e = np.exp(x)
    return (e / e.sum()).astype(np.float32)


def wot_forward(input_emb, trigger_pos: List[List[int]], ls: List[int],
                *, ot_eps: float = 0.1, ot_max_iter: int = 100,
                ot_thresh: float = 0.1, null_prob: float = 0.5,
                batch_block: int = 128):
    bs = len(trigger_pos)
    input_emb = jnp.asarray(input_emb, jnp.float32)

    # ---- tiny per-example index tables + marginals (positions only; no embedding data)
    # TODO(synk): this ragged per-example bookkeeping operates on Python lists in the
    # original module as well; only the index tables / marginals cross the host boundary.
    trig_p, ctx_pos = [], []
    for i in range(bs):
        tp = list(trigger_pos[i])
        cp = sorted(set(range(ls[i])) - set(tp))
        trig_p.append(tp)
        ctx_pos.append(cp)

    nt_max = max(max(len(tp) for tp in trig_p), 1)
    nc_max = max(max(len(cp) for cp in ctx_pos), 1)
    Nt = _round_up(nt_max + 1, 8)             # +1 null row, sublane aligned
    Nc = _round_up(nc_max, 128)               # context sits on the 128-lane axis

    trig_idx = np.zeros((bs, Nt - 1), np.int32)
    ctx_idx = np.zeros((bs, Nc), np.int32)
    trig_marg = np.zeros((bs, Nt), np.float32)
    ctx_marg = np.zeros((bs, Nc), np.float32)
    ctx_mask = np.zeros((bs, Nc), np.float32)
    ctx_count = np.ones((bs,), np.float32)

    for i in range(bs):
        tp, cp = trig_p[i], ctx_pos[i]
        ntp, ncp = len(tp), len(cp)
        trig_marg[i, 0] = null_prob
        if ntp:
            trig_idx[i, :ntp] = tp
            trig_marg[i, 1:1 + ntp] = (1.0 - null_prob) / ntp
        if ncp:
            ctx_idx[i, :ncp] = cp
            ctx_mask[i, :ncp] = 1.0
            ctx_count[i] = float(ncp)
            if ntp:
                dist = np.min(np.abs(np.asarray(cp, np.float32)[None, :]
                                     - np.asarray(tp, np.float32)[:, None]), axis=0)
            else:
                dist = np.zeros((ncp,), np.float32)
            # (original calls nn.Softmax(tensor, dim=0); intended semantics = softmax over dim 0)
            ctx_marg[i, :ncp] = _np_softmax(dist)
        # TODO(synk): an example with zero context tokens is undefined in the reference
        # (mean over an empty tensor); it is left with zero context marginal here.

    # ---- on-device gather: no device->host round trip of the embedding tensor
    gather = jax.vmap(lambda e, idx: jnp.take(e, idx, axis=0))
    ctx_emb = gather(input_emb, jnp.asarray(ctx_idx))            # (bs, Nc, D)
    trig_gather = gather(input_emb, jnp.asarray(trig_idx))       # (bs, Nt-1, D)
    cmask = jnp.asarray(ctx_mask)[:, :, None]
    null_emb = (jnp.sum(ctx_emb * cmask, axis=1, keepdims=True)
                / jnp.asarray(ctx_count)[:, None, None])         # (bs, 1, D)
    trigger_emb = jnp.concatenate([null_emb, trig_gather], axis=1)   # (bs, Nt, D)
    ctx_emb_t = jnp.swapaxes(ctx_emb, 1, 2)                      # (bs, D, Nc) MXU-natural RHS

    cost_pb, align = run_sinkhorn(ctx_emb_t, trigger_emb,
                                  jnp.asarray(ctx_marg), jnp.asarray(trig_marg),
                                  eps=ot_eps, max_iter=ot_max_iter,
                                  thresh=ot_thresh, batch_block=batch_block)
    cost = jnp.mean(cost_pb)                                     # reduction='mean'

    align_np = np.asarray(jax.device_get(align))                 # (bs, Nc) int32 — tiny
    important_words = []
    for i in range(bs):
        tp, cp = trig_p[i], ctx_pos[i]
        _iw = list(tp)
        algin = list(align_np[i] - 1)[0:len(cp)]                 # null row -> -1
        for _trigger_id, context_id in zip(algin, cp):
            if _trigger_id >= 0:
                _iw.append(int(context_id))
        important_words.append(_iw)

    return cost, important_words


# ---------------------------------------------------------------------------- main

if __name__ == "__main__":
    key = jax.random.PRNGKey(0)
    bs, seq, hidden = 2, 8, 32
    input_emb = jax.random.normal(key, (bs, seq, hidden), dtype=jnp.float32)
    trigger_pos = [[1, 3], [2]]
    ls = [8, 7]

    cost, important_words = wot_forward(input_emb, trigger_pos, ls,
                                        ot_eps=0.1, ot_max_iter=100,
                                        ot_thresh=0.1, null_prob=0.5)
    jax.block_until_ready(cost)
    _ = important_words
    print("KERNEL_OK")
</pallas_src>

<mosaic_0001>
module attributes {stable_mosaic.version = 11 : i64} {
  func.func @wot_sinkhorn_kernel(%arg0: i32, %arg1: memref<1x32x128xf32, #tpu.memory_space<vmem>>, %arg2: memref<1x8x32xf32, #tpu.memory_space<vmem>>, %arg3: memref<1x1x128xf32, #tpu.memory_space<vmem>>, %arg4: memref<1x8x1xf32, #tpu.memory_space<vmem>>, %arg5: memref<1x1x128xi32, #tpu.memory_space<vmem>>, %arg6: memref<1x1x1xf32, #tpu.memory_space<vmem>>) attributes {dimension_semantics = [#tpu.dimension_semantics<parallel>], iteration_bounds = array<i64: 2>, scalar_prefetch = 0 : i64, scratch_operands = 0 : i64, tpu.core_type = #tpu.core_type<tc>, window_params = [{transform_indices = @transform_0, window_bounds = array<i64: 1, 32, 128>}, {transform_indices = @transform_1, window_bounds = array<i64: 1, 8, 32>}, {transform_indices = @transform_2, window_bounds = array<i64: 1, 1, 128>}, {transform_indices = @transform_3, window_bounds = array<i64: 1, 8, 1>}, {transform_indices = @transform_4, window_bounds = array<i64: 1, 1, 128>}, {transform_indices = @transform_5, window_bounds = array<i64: 1, 1, 1>}]} {
    %c0 = arith.constant 0 : index
    %c0_0 = arith.constant 0 : index
    %c0_1 = arith.constant 0 : index
    %0 = vector.load %arg1[%c0, %c0_0, %c0_1] : memref<1x32x128xf32, #tpu.memory_space<vmem>>, vector<1x32x128xf32>
    %c0_2 = arith.constant 0 : index
    %c0_3 = arith.constant 0 : index
    %c0_4 = arith.constant 0 : index
    %1 = vector.load %arg2[%c0_2, %c0_3, %c0_4] : memref<1x8x32xf32, #tpu.memory_space<vmem>>, vector<1x8x32xf32>
    %c0_5 = arith.constant 0 : index
    %c0_6 = arith.constant 0 : index
    %c0_7 = arith.constant 0 : index
    %2 = vector.load %arg3[%c0_5, %c0_6, %c0_7] : memref<1x1x128xf32, #tpu.memory_space<vmem>>, vector<1x1x128xf32>
    %c0_8 = arith.constant 0 : index
    %c0_9 = arith.constant 0 : index
    %c0_10 = arith.constant 0 : index
    %3 = vector.load %arg4[%c0_8, %c0_9, %c0_10] : memref<1x8x1xf32, #tpu.memory_space<vmem>>, vector<1x8x1xf32>
    "tpu.trace_start"() <{level = 10 : i32, message = "btd,bdc->btc"}> : () -> ()
    %cst = arith.constant dense<0.000000e+00> : vector<1x8x128xf32>
    %4 = tpu.matmul %1, %0, %cst {dimension_numbers = #tpu.dot_dimension_numbers<[2], [1], [1], [2], [0, 0, 0, 1, 1, 2], [0], [0]>} : vector<1x8x32xf32>, vector<1x32x128xf32>, vector<1x8x128xf32> -> vector<1x8x128xf32>
    "tpu.trace_stop"() : () -> ()
    %5 = arith.mulf %0, %0 : vector<1x32x128xf32>
    %cst_11 = arith.constant dense<0.000000e+00> : vector<1x128xf32>
    %6 = vector.multi_reduction <add>, %5, %cst_11 [1] : vector<1x32x128xf32> to vector<1x128xf32>
    %7 = vector.shape_cast %6 : vector<1x128xf32> to vector<1x1x128xf32>
    %8 = arith.mulf %1, %1 : vector<1x8x32xf32>
    %cst_12 = arith.constant dense<0.000000e+00> : vector<1x8xf32>
    %9 = vector.multi_reduction <add>, %8, %cst_12 [2] : vector<1x8x32xf32> to vector<1x8xf32>
    %10 = vector.shape_cast %9 : vector<1x8xf32> to vector<1x8x1xf32>
    %cst_13 = arith.constant 2.000000e+00 : f32
    %11 = vector.broadcast %cst_13 : f32 to vector<1x8x128xf32>
    %12 = arith.mulf %11, %4 : vector<1x8x128xf32>
    %13 = vector.broadcast %7 : vector<1x1x128xf32> to vector<1x8x128xf32>
    %14 = arith.subf %12, %13 : vector<1x8x128xf32>
    %15 = vector.broadcast %10 : vector<1x8x1xf32> to vector<1x8x128xf32>
    %16 = arith.subf %14, %15 : vector<1x8x128xf32>
    %cst_14 = arith.constant 1.000000e+01 : f32
    %17 = vector.broadcast %cst_14 : f32 to vector<1x8x128xf32>
    %18 = arith.mulf %16, %17 : vector<1x8x128xf32>
    %cst_15 = arith.constant 0.000000e+00 : f32
    %19 = vector.broadcast %cst_15 : f32 to vector<1x8x128xf32>
    %20 = arith.minimumf %18, %19 : vector<1x8x128xf32>
    %cst_16 = arith.constant 0.000000e+00 : f32
    %21 = vector.broadcast %cst_16 : f32 to vector<1x1x128xf32>
    %22 = arith.cmpf ogt, %2, %21 : vector<1x1x128xf32>
    %23 = arith.extui %22 : vector<1x1x128xi1> to vector<1x1x128xi32>
    %24 = arith.sitofp %23 : vector<1x1x128xi32> to vector<1x1x128xf32>
    %cst_17 = arith.constant 0.000000e+00 : f32
    %25 = vector.broadcast %cst_17 : f32 to vector<1x1x128xf32>
    %26 = arith.cmpf ogt, %2, %25 : vector<1x1x128xf32>
    %cst_18 = arith.constant 9.99999993E-9 : f32
    %27 = vector.broadcast %cst_18 : f32 to vector<1x1x128xf32>
    %28 = arith.addf %2, %27 : vector<1x1x128xf32>
    %cst_19 = arith.constant 0.000000e+00 : f32
    %29 = vector.broadcast %cst_19 : f32 to vector<1x1x128xf32>
    %30 = arith.select %26, %28, %29 : vector<1x1x128xi1>, vector<1x1x128xf32>
    %cst_20 = arith.constant 0.000000e+00 : f32
    %31 = vector.broadcast %cst_20 : f32 to vector<1x1x128xf32>
    %32 = arith.cmpf ogt, %2, %31 : vector<1x1x128xf32>
    %cst_21 = arith.constant 9.99999993E-9 : f32
    %33 = vector.broadcast %cst_21 : f32 to vector<1x1x128xf32>
    %34 = arith.addf %2, %33 : vector<1x1x128xf32>
    %35 = math.log %34 : vector<1x1x128xf32>
    %cst_22 = arith.constant -1.000000e+09 : f32
    %36 = vector.broadcast %cst_22 : f32 to vector<1x1x128xf32>
    %37 = arith.select %32, %35, %36 : vector<1x1x128xi1>, vector<1x1x128xf32>
    %cst_23 = arith.constant 0.000000e+00 : f32
    %38 = vector.broadcast %cst_23 : f32 to vector<1x8x1xf32>
    %39 = arith.cmpf ogt, %3, %38 : vector<1x8x1xf32>
    %cst_24 = arith.constant 9.99999993E-9 : f32
    %40 = vector.broadcast %cst_24 : f32 to vector<1x8x1xf32>
    %41 = arith.addf %3, %40 : vector<1x8x1xf32>
    %42 = math.log %41 : vector<1x8x1xf32>
    %cst_25 = arith.constant -1.000000e+09 : f32
    %43 = vector.broadcast %cst_25 : f32 to vector<1x8x1xf32>
    %44 = arith.select %39, %42, %43 : vector<1x8x1xi1>, vector<1x8x1xf32>
    %cst_26 = arith.constant dense<0.000000e+00> : vector<1x1xf32>
    %45 = vector.multi_reduction <add>, %24, %cst_26 [2] : vector<1x1x128xf32> to vector<1x1xf32>
    %46 = vector.shape_cast %45 : vector<1x1xf32> to vector<1x1x1xf32>
    %cst_27 = arith.constant 0.000000e+00 : f32
    %47 = vector.broadcast %cst_27 : f32 to vector<1x1x1xf32>
    %48 = arith.cmpf ogt, %46, %47 : vector<1x1x1xf32>
    %49 = arith.extui %48 : vector<1x1x1xi1> to vector<1x1x1xi32>
    %50 = arith.sitofp %49 : vector<1x1x1xi32> to vector<1x1x1xf32>
    %51 = vector.shape_cast %50 : vector<1x1x1xf32> to vector<1x1x1x1xf32>
    %cst_28 = arith.constant dense<0.000000e+00> : vector<1xf32>
    %52 = vector.multi_reduction <add>, %51, %cst_28 [1, 2, 3] : vector<1x1x1x1xf32> to vector<1xf32>
    %53 = vector.shape_cast %52 : vector<1xf32> to vector<1x1x1x1xf32>
    %54 = vector.extract %53[0, 0, 0, 0] : f32 from vector<1x1x1x1xf32>
    %cst_29 = arith.constant 1.000000e+00 : f32
    %55 = arith.maximumf %54, %cst_29 : f32
    %cst_30 = arith.constant 0.000000e+00 : f32
    %56 = vector.broadcast %cst_30 : f32 to vector<1x1x128xf32>
    %cst_31 = arith.constant 0.000000e+00 : f32
    %57 = vector.broadcast %cst_31 : f32 to vector<1x8x1xf32>
    %c0_i32 = arith.constant 0 : i32
    %cst_32 = arith.constant 1.000000e+30 : f32
    %58:4 = scf.while (%arg7 = %c0_i32, %arg8 = %cst_32, %arg9 = %56, %arg10 = %57) : (i32, f32, vector<1x1x128xf32>, vector<1x8x1xf32>) -> (i32, f32, vector<1x1x128xf32>, vector<1x8x1xf32>) {
      %c100_i32 = arith.constant 100 : i32
      %82 = arith.cmpi slt, %arg7, %c100_i32 : i32
      %cst_44 = arith.constant 1.000000e-01 : f32
      %83 = arith.cmpf oge, %arg8, %cst_44 : f32
      %84 = arith.andi %82, %83 : i1
      scf.condition(%84) %arg7, %arg8, %arg9, %arg10 : i32, f32, vector<1x1x128xf32>, vector<1x8x1xf32>
    } do {
    ^bb0(%arg7: i32, %arg8: f32, %arg9: vector<1x1x128xf32>, %arg10: vector<1x8x1xf32>):
      %c0_i32_44 = arith.constant 0 : i32
      %82 = vector.broadcast %arg9 : vector<1x1x128xf32> to vector<1x8x128xf32>
      %83 = arith.addf %20, %82 : vector<1x8x128xf32>
      %84 = vector.broadcast %arg10 : vector<1x8x1xf32> to vector<1x8x128xf32>
      %85 = arith.addf %83, %84 : vector<1x8x128xf32>
      %cst_45 = arith.constant dense<0xFF800000> : vector<1x128xf32>
      %86 = vector.multi_reduction <maximumf>, %85, %cst_45 [1] : vector<1x8x128xf32> to vector<1x128xf32>
      %87 = vector.shape_cast %86 : vector<1x128xf32> to vector<1x1x128xf32>
      %88 = vector.broadcast %87 : vector<1x1x128xf32> to vector<1x8x128xf32>
      %89 = arith.subf %85, %88 : vector<1x8x128xf32>
      %90 = math.exp %89 : vector<1x8x128xf32>
      %cst_46 = arith.constant dense<0.000000e+00> : vector<1x128xf32>
      %91 = vector.multi_reduction <add>, %90, %cst_46 [1] : vector<1x8x128xf32> to vector<1x128xf32>
      %92 = vector.shape_cast %91 : vector<1x128xf32> to vector<1x1x128xf32>
      %93 = math.log %92 : vector<1x1x128xf32>
      %94 = arith.addf %93, %87 : vector<1x1x128xf32>
      %95 = arith.subf %37, %94 : vector<1x1x128xf32>
      %96 = arith.addf %95, %arg9 : vector<1x1x128xf32>
      %97 = tpu.reciprocal %92 {approx = true} : vector<1x1x128xf32> -> vector<1x1x128xf32>
      %98 = arith.mulf %30, %97 : vector<1x1x128xf32>
      %99 = vector.broadcast %98 : vector<1x1x128xf32> to vector<1x8x128xf32>
      %100 = arith.mulf %90, %99 : vector<1x8x128xf32>
      %cst_47 = arith.constant dense<0.000000e+00> : vector<1x8xf32>
      %101 = vector.multi_reduction <add>, %100, %cst_47 [2] : vector<1x8x128xf32> to vector<1x8xf32>
      %102 = vector.shape_cast %101 : vector<1x8xf32> to vector<1x8x1xf32>
      %cst_48 = arith.constant 1.000000e-35 : f32
      %103 = vector.broadcast %cst_48 : f32 to vector<1x8x1xf32>
      %104 = arith.maximumf %102, %103 : vector<1x8x1xf32>
      %105 = math.log %104 : vector<1x8x1xf32>
      %106 = arith.subf %44, %105 : vector<1x8x1xf32>
      %107 = arith.addf %106, %arg10 : vector<1x8x1xf32>
      %c1_i32 = arith.constant 1 : i32
      %108 = vector.broadcast %96 : vector<1x1x128xf32> to vector<1x8x128xf32>
      %109 = arith.addf %20, %108 : vector<1x8x128xf32>
      %110 = vector.broadcast %107 : vector<1x8x1xf32> to vector<1x8x128xf32>
      %111 = arith.addf %109, %110 : vector<1x8x128xf32>
      %cst_49 = arith.constant dense<0xFF800000> : vector<1x128xf32>
      %112 = vector.multi_reduction <maximumf>, %111, %cst_49 [1] : vector<1x8x128xf32> to vector<1x128xf32>
      %113 = vector.shape_cast %112 : vector<1x128xf32> to vector<1x1x128xf32>
      %114 = vector.broadcast %113 : vector<1x1x128xf32> to vector<1x8x128xf32>
      %115 = arith.subf %111, %114 : vector<1x8x128xf32>
      %116 = math.exp %115 : vector<1x8x128xf32>
      %cst_50 = arith.constant dense<0.000000e+00> : vector<1x128xf32>
      %117 = vector.multi_reduction <add>, %116, %cst_50 [1] : vector<1x8x128xf32> to vector<1x128xf32>
      %118 = vector.shape_cast %117 : vector<1x128xf32> to vector<1x1x128xf32>
      %119 = math.log %118 : vector<1x1x128xf32>
      %120 = arith.addf %119, %113 : vector<1x1x128xf32>
      %121 = arith.subf %37, %120 : vector<1x1x128xf32>
      %122 = arith.addf %121, %96 : vector<1x1x128xf32>
      %123 = tpu.reciprocal %118 {approx = true} : vector<1x1x128xf32> -> vector<1x1x128xf32>
      %124 = arith.mulf %30, %123 : vector<1x1x128xf32>
      %125 = vector.broadcast %124 : vector<1x1x128xf32> to vector<1x8x128xf32>
      %126 = arith.mulf %116, %125 : vector<1x8x128xf32>
      %cst_51 = arith.constant dense<0.000000e+00> : vector<1x8xf32>
      %127 = vector.multi_reduction <add>, %126, %cst_51 [2] : vector<1x8x128xf32> to vector<1x8xf32>
      %128 = vector.shape_cast %127 : vector<1x8xf32> to vector<1x8x1xf32>
      %cst_52 = arith.constant 1.000000e-35 : f32
      %129 = vector.broadcast %cst_52 : f32 to vector<1x8x1xf32>
      %130 = arith.maximumf %128, %129 : vector<1x8x1xf32>
      %131 = math.log %130 : vector<1x8x1xf32>
      %132 = arith.subf %44, %131 : vector<1x8x1xf32>
      %133 = arith.addf %132, %107 : vector<1x8x1xf32>
      %c2_i32 = arith.constant 2 : i32
      %134 = vector.broadcast %122 : vector<1x1x128xf32> to vector<1x8x128xf32>
      %135 = arith.addf %20, %134 : vector<1x8x128xf32>
      %136 = vector.broadcast %133 : vector<1x8x1xf32> to vector<1x8x128xf32>
      %137 = arith.addf %135, %136 : vector<1x8x128xf32>
      %cst_53 = arith.constant dense<0xFF800000> : vector<1x128xf32>
      %138 = vector.multi_reduction <maximumf>, %137, %cst_53 [1] : vector<1x8x128xf32> to vector<1x128xf32>
      %139 = vector.shape_cast %138 : vector<1x128xf32> to vector<1x1x128xf32>
      %140 = vector.broadcast %139 : vector<1x1x128xf32> to vector<1x8x128xf32>
      %141 = arith.subf %137, %140 : vector<1x8x128xf32>
      %142 = math.exp %141 : vector<1x8x128xf32>
      %cst_54 = arith.constant dense<0.000000e+00> : vector<1x128xf32>
      %143 = vector.multi_reduction <add>, %142, %cst_54 [1] : vector<1x8x128xf32> to vector<1x128xf32>
      %144 = vector.shape_cast %143 : vector<1x128xf32> to vector<1x1x128xf32>
      %145 = math.log %144 : vector<1x1x128xf32>
      %146 = arith.addf %145, %139 : vector<1x1x128xf32>
      %147 = arith.subf %37, %146 : vector<1x1x128xf32>
      %148 = arith.addf %147, %122 : vector<1x1x128xf32>
      %149 = tpu.reciprocal %144 {approx = true} : vector<1x1x128xf32> -> vector<1x1x128xf32>
      %150 = arith.mulf %30, %149 : vector<1x1x128xf32>
      %151 = vector.broadcast %150 : vector<1x1x128xf32> to vector<1x8x128xf32>
      %152 = arith.mulf %142, %151 : vector<1x8x128xf32>
      %cst_55 = arith.constant dense<0.000000e+00> : vector<1x8xf32>
      %153 = vector.multi_reduction <add>, %152, %cst_55 [2] : vector<1x8x128xf32> to vector<1x8xf32>
      %154 = vector.shape_cast %153 : vector<1x8xf32> to vector<1x8x1xf32>
      %cst_56 = arith.constant 1.000000e-35 : f32
      %155 = vector.broadcast %cst_56 : f32 to vector<1x8x1xf32>
      %156 = arith.maximumf %154, %155 : vector<1x8x1xf32>
      %157 = math.log %156 : vector<1x8x1xf32>
      %158 = arith.subf %44, %157 : vector<1x8x1xf32>
      %159 = arith.addf %158, %133 : vector<1x8x1xf32>
      %c3_i32 = arith.constant 3 : i32
      %160 = vector.broadcast %148 : vector<1x1x128xf32> to vector<1x8x128xf32>
      %161 = arith.addf %20, %160 : vector<1x8x128xf32>
      %162 = vector.broadcast %159 : vector<1x8x1xf32> to vector<1x8x128xf32>
      %163 = arith.addf %161, %162 : vector<1x8x128xf32>
      %cst_57 = arith.constant dense<0xFF800000> : vector<1x128xf32>
      %164 = vector.multi_reduction <maximumf>, %163, %cst_57 [1] : vector<1x8x128xf32> to vector<1x128xf32>
      %165 = vector.shape_cast %164 : vector<1x128xf32> to vector<1x1x128xf32>
      %166 = vector.broadcast %165 : vector<1x1x128xf32> to vector<1x8x128xf32>
      %167 = arith.subf %163, %166 : vector<1x8x128xf32>
      %168 = math.exp %167 : vector<1x8x128xf32>
      %cst_58 = arith.constant dense<0.000000e+00> : vector<1x128xf32>
      %169 = vector.multi_reduction <add>, %168, %cst_58 [1] : vector<1x8x128xf32> to vector<1x128xf32>
      %170 = vector.shape_cast %169 : vector<1x128xf32> to vector<1x1x128xf32>
      %171 = math.log %170 : vector<1x1x128xf32>
      %172 = arith.addf %171, %165 : vector<1x1x128xf32>
      %173 = arith.subf %37, %172 : vector<1x1x128xf32>
      %174 = arith.addf %173, %148 : vector<1x1x128xf32>
      %175 = tpu.reciprocal %170 {approx = true} : vector<1x1x128xf32> -> vector<1x1x128xf32>
      %176 = arith.mulf %30, %175 : vector<1x1x128xf32>
      %177 = vector.broadcast %176 : vector<1x1x128xf32> to vector<1x8x128xf32>
      %178 = arith.mulf %168, %177 : vector<1x8x128xf32>
      %cst_59 = arith.constant dense<0.000000e+00> : vector<1x8xf32>
      %179 = vector.multi_reduction <add>, %178, %cst_59 [2] : vector<1x8x128xf32> to vector<1x8xf32>
      %180 = vector.shape_cast %179 : vector<1x8xf32> to vector<1x8x1xf32>
      %cst_60 = arith.constant 1.000000e-35 : f32
      %181 = vector.broadcast %cst_60 : f32 to vector<1x8x1xf32>
      %182 = arith.maximumf %180, %181 : vector<1x8x1xf32>
      %183 = math.log %182 : vector<1x8x1xf32>
      %184 = arith.subf %44, %183 : vector<1x8x1xf32>
      %185 = arith.addf %184, %159 : vector<1x8x1xf32>
      %c4_i32 = arith.constant 4 : i32
      %186 = arith.subf %174, %148 : vector<1x1x128xf32>
      %187 = math.absf %186 : vector<1x1x128xf32>
      %188 = arith.mulf %187, %24 : vector<1x1x128xf32>
      %189 = vector.shape_cast %188 : vector<1x1x128xf32> to vector<1x1x1x128xf32>
      %cst_61 = arith.constant dense<0.000000e+00> : vector<1xf32>
      %190 = vector.multi_reduction <add>, %189, %cst_61 [1, 2, 3] : vector<1x1x1x128xf32> to vector<1xf32>
      %191 = vector.shape_cast %190 : vector<1xf32> to vector<1x1x1x1xf32>
      %192 = vector.extract %191[0, 0, 0, 0] : f32 from vector<1x1x1x1xf32>
      %cst_62 = arith.constant 1.000000e-01 : f32
      %193 = arith.mulf %cst_62, %192 : f32
      %194 = arith.divf %193, %55 : f32
      %c4_i32_63 = arith.constant 4 : i32
      %195 = arith.addi %arg7, %c4_i32_63 : i32
      scf.yield %195, %194, %174, %185 : i32, f32, vector<1x1x128xf32>, vector<1x8x1xf32>
    }
    %59 = vector.broadcast %58#2 : vector<1x1x128xf32> to vector<1x8x128xf32>
    %60 = arith.addf %20, %59 : vector<1x8x128xf32>
    %61 = vector.broadcast %58#3 : vector<1x8x1xf32> to vector<1x8x128xf32>
    %62 = arith.addf %60, %61 : vector<1x8x128xf32>
    %63 = math.exp %62 : vector<1x8x128xf32>
    %64 = arith.mulf %63, %20 : vector<1x8x128xf32>
    %cst_33 = arith.constant dense<0.000000e+00> : vector<1x8xf32>
    %65 = vector.multi_reduction <add>, %64, %cst_33 [2] : vector<1x8x128xf32> to vector<1x8xf32>
    %66 = vector.shape_cast %65 : vector<1x8xf32> to vector<1x8x1xf32>
    %cst_34 = arith.constant dense<0.000000e+00> : vector<1x1xf32>
    %67 = vector.multi_reduction <add>, %66, %cst_34 [1] : vector<1x8x1xf32> to vector<1x1xf32>
    %68 = vector.shape_cast %67 : vector<1x1xf32> to vector<1x1x1xf32>
    %cst_35 = arith.constant -1.000000e-01 : f32
    %69 = vector.broadcast %cst_35 : f32 to vector<1x1x1xf32>
    %70 = arith.mulf %69, %68 : vector<1x1x1xf32>
    %c0_36 = arith.constant 0 : index
    %c0_37 = arith.constant 0 : index
    %c0_38 = arith.constant 0 : index
    %71 = vector.load %arg6[%c0_36, %c0_37, %c0_38] : memref<1x1x1xf32, #tpu.memory_space<vmem>>, vector<1x1x1xf32>
    tpu.vector_store %arg6[%c0_36, %c0_37, %c0_38], %70 {strides = array<i32>} : memref<1x1x1xf32, #tpu.memory_space<vmem>>, vector<1x1x1xf32>,
    %cst_39 = arith.constant dense<0xFF800000> : vector<1x128xf32>
    %72 = vector.multi_reduction <maximumf>, %63, %cst_39 [1] : vector<1x8x128xf32> to vector<1x128xf32>
    %73 = vector.shape_cast %72 : vector<1x128xf32> to vector<1x1x128xf32>
    %74 = tpu.iota {dimensions = array<i32: 1>} : vector<1x8x128xi32>
    %75 = vector.broadcast %73 : vector<1x1x128xf32> to vector<1x8x128xf32>
    %76 = arith.cmpf oge, %63, %75 : vector<1x8x128xf32>
    %c8_i32 = arith.constant 8 : i32
    %77 = vector.broadcast %c8_i32 : i32 to vector<1x8x128xi32>
    %78 = arith.select %76, %74, %77 : vector<1x8x128xi1>, vector<1x8x128xi32>
    %cst_40 = arith.constant dense<2147483647> : vector<1x128xi32>
    %79 = vector.multi_reduction <minsi>, %78, %cst_40 [1] : vector<1x8x128xi32> to vector<1x128xi32>
    %80 = vector.shape_cast %79 : vector<1x128xi32> to vector<1x1x128xi32>
    %c0_41 = arith.constant 0 : index
    %c0_42 = arith.constant 0 : index
    %c0_43 = arith.constant 0 : index
    %81 = vector.load %arg5[%c0_41, %c0_42, %c0_43] : memref<1x1x128xi32, #tpu.memory_space<vmem>>, vector<1x1x128xi32>
    tpu.vector_store %arg5[%c0_41, %c0_42, %c0_43], %80 {strides = array<i32>} : memref<1x1x128xi32, #tpu.memory_space<vmem>>, vector<1x1x128xi32>,
    return
  }
  func.func @transform_0(%arg0: i32) -> (i32, i32, i32) {
    %c0_i32 = arith.constant 0 : i32
    %c0_i32_0 = arith.constant 0 : i32
    %c0_i32_1 = arith.constant 0 : i32
    return %arg0, %c0_i32, %c0_i32_0 : i32, i32, i32
  }
  func.func @transform_1(%arg0: i32) -> (i32, i32, i32) {
    %c0_i32 = arith.constant 0 : i32
    %c0_i32_0 = arith.constant 0 : i32
    %c0_i32_1 = arith.constant 0 : i32
    return %arg0, %c0_i32, %c0_i32_0 : i32, i32, i32
  }
  func.func @transform_2(%arg0: i32) -> (i32, i32, i32) {
    %c0_i32 = arith.constant 0 : i32
    %c0_i32_0 = arith.constant 0 : i32
    %c0_i32_1 = arith.constant 0 : i32
    return %arg0, %c0_i32, %c0_i32_0 : i32, i32, i32
  }
  func.func @transform_3(%arg0: i32) -> (i32, i32, i32) {
    %c0_i32 = arith.constant 0 : i32
    %c0_i32_0 = arith.constant 0 : i32
    %c0_i32_1 = arith.constant 0 : i32
    return %arg0, %c0_i32, %c0_i32_0 : i32, i32, i32
  }
  func.func @transform_4(%arg0: i32) -> (i32, i32, i32) {
    %c0_i32 = arith.constant 0 : i32
    %c0_i32_0 = arith.constant 0 : i32
    %c0_i32_1 = arith.constant 0 : i32
    return %arg0, %c0_i32, %c0_i32_0 : i32, i32, i32
  }
  func.func @transform_5(%arg0: i32) -> (i32, i32, i32) {
    %c0_i32 = arith.constant 0 : i32
    %c0_i32_0 = arith.constant 0 : i32
    %c0_i32_1 = arith.constant 0 : i32
    return %arg0, %c0_i32, %c0_i32_0 : i32, i32, i32
  }
}

</mosaic_0001>

<bundles_post_ra>
// kernel: tpu_custom_call.1
= control target key start
LH: loop header
LB: loop body
LE: loop exit
PB: predicated region body
PF: predicated region fallthrough
CT: control target
= control target key end

     0   :  { %11 = vsyncpa [#allocation3], 0  ;;  %s1303_s0 = inlined_call_operand.hbm [shape: f32[2,32,128], index: 0, kind: input, shape index: {}]   ;;  %s1304_s1 = inlined_call_operand.vmem [shape: f32[2,8,32], index: 1, kind: input, shape index: {}]   ;;  %s1305_s2 = inlined_call_operand.vmem [shape: f32[2,1,128], index: 2, kind: input, shape index: {}]   ;;  %s1306_s3 = inlined_call_operand.vmem [shape: f32[2,8,1], index: 3, kind: input, shape index: {}]   ;;  %s1307_s4 = inlined_call_operand.hbm [shape: s32[2,1,128], index: 4, kind: output, shape index: {0}]   ;;  %s1308_s5 = inlined_call_operand.vmem [shape: f32[2,1,1], index: 5, kind: output, shape index: {1}]  }
   0x1   :  { %13 = vsyncpa [#allocation3 + $0x1], 0 }
   0x2   :  { %14 = vsyncpa [#allocation4], 0 }
   0x3   :  { %16 = vsyncpa [#allocation4 + $0x1], 0  ;;  %s1087_s18 = smov 0   ;;  %s1089_s19 = smov 0  }
   0x4   :  { %s1091_s20 = smov 0   ;;  %s1093_s21 = smov 0  }
   0x5 LB: > { %s1108_s22 = sadd.s32 4294967295, %s1037_s21   ;;  %s787_s23 = sadd.s32 4294967294, %s1037_s21   ;;  %s1037_s21 = sphi %s1093_s21, %s1321_s21   ;;  %s1033_s20 = sphi %s1091_s20, %s1320_s20   ;;  %s1029_s19 = sphi %s1089_s19, %s1319_s19   ;;  %s1025_s18 = sphi %s1087_s18, %s1318_s18  }
   0x6   : > { %s1112_s24 = sadd.s32 1, %s1037_s21   ;;  %s29_s25 = sadd.s32 1, %s1033_s20 }
   0x7   : > { %s26_s26 = ssub.s32 %s1037_s21, %s1112_s24  ;;  %p36_p0 = scmp.ne.s32.totalorder %s1033_s20, %s1029_s19 }
   0x8   : > { %p27_p1 = scmp.eq.s32.totalorder %s26_s26, 0  ;;  %p37_p2 = scmp.eq.s32.totalorder %s1037_s21, 0 }
   0x9   : > { %p42_p3 = scmp.ne.s32.totalorder %s1029_s19, %s1025_s18  ;;  %p43_p4 = scmp.eq.s32.totalorder %s1108_s22, 0 }
   0xa   : > { %s1124_s27 = scalar_select %p27_p1, %s1033_s20, %s29_s25  }
   0xb   : > { %p1126_p5 = por %p37_p2, %p36_p0  ;;  %p1130_p6 = por %p43_p4, %p42_p3 }
   0xc   : > { %p144_p7 = scmp.eq.s32.totalorder %s1108_s22, 1  ;;  %p150_p8 = scmp.eq.s32.totalorder %s787_s23, 1 }
   0xd   : > { %p821_p10 = scmp.lt.s32.totalorder %s1037_s21, 2  ;;  %s196_s7 = sand.u32 1, %s1033_s20  }
   0xe   : > { %p1137_p11 = por %p144_p7, %p36_p0  ;;  %p1141_p12 = por %p150_p8, %p42_p3 }
   0xf   : > { %s802_s8 = sshll.u32 %s1037_s21, 5  ;;  %s790_s9 = sshll.u32 %s196_s7, 5 }
  0x10   : > { %s205_s12 = scalar_lea.hbm %s1303_s0, %s802_s8  ;;  %s200_s14 = scalar_lea.vmem [#allocation2], %s790_s9 }
  0x11   : > { %s206_s13 = sshll.u32 %s205_s12, 4  ;;  %s208_s15 = sshll.u32 %s200_s14, 4  ;;  %s207_s13 = int_to_ptr.hbm [resolvable:$true] %s206_s13  ;;  %s209_s15 = int_to_ptr.vmem [resolvable:$true] %s208_s15 }
  0x12   : > { %p1152_p13 = pnand %p821_p10, %p1126_p5  ;;  %p793_p0 = scmp.ge.s32.totalorder %s1037_s21, 1 }
  0x13   : > { %p236_p1 = scmp.lt.s32.totalorder %s1037_s21, 3  ;;  %s197_s17 = scalar_lea.sflag [#allocation3], %s196_s7 }
  0x14   : > { %s929_s23 = sshra.s32 %s207_s13, 4  ;;  %p933_p3 = pneg %p1152_p13  ;;  %s930_s23 = int_to_ptr.hbm [resolvable:$true] %s929_s23 }
  0x15   : > { %s931_s25 = scalar_lea.hbm %s930_s23, 32  ;;  %s936_s28 = scalar_lea.hbm %s1303_s0, 64 }
  0x16   : > { %p932_p2 = scmp.ne.s32.totalorder %s930_s23, %s931_s25  ;;  %p937_p5 = scmp.lt.s32.totalorder %s930_s23, %s1303_s0 }
  0x17   : > { %p938_p8 = scmp.lt.s32.totalorder %s936_s28, %s931_s25 }
  0x18   : > { %p934_p4 = pnand %p933_p3, %p932_p2 }
  0x19   : > { %p939_p10 = por %p938_p8, %p937_p5 }
  0x1a   : > { %p935_p7 = pneg %p934_p4 }
  0x1c   : > { %p940_p9 = pnand %p939_p10, %p935_p7 }
  0x1e   : > { %943 = shalt.err (!%p940_p9)
}
  0x1f   : > { %s1051_s7 = smov 128   ;;  %s1052_s11 = smov 8  }
  0x20   : > { %816 = dma.hbm_to_vmem [thread:$0]  (!%p1152_p13), %s207_s13, 512, %s209_s15, %s197_s17, %s1051_s7, %s1051_s7, %s1052_s11  }
  0x21   : > { %p237_p2 = pnand %p793_p0, %p236_p1 }
  0x22   : > { %s1173_s12 = sand.u32 (!%p237_p2), 1, %s1029_s19  }
  0x23   : > { %240 = sbr.rel (%p237_p2) target bundleno = 1683 (0x693), region = 36  ;;  %s794_s14 = sshll.u32 (!%p237_p2), %s1173_s12, 5 }
  0x24   : > { %s243_s23 = scalar_lea.sflag (!%p237_p2), [#allocation3], %s1173_s12  ;;  %s246_s25 = scalar_lea.vmem (!%p237_p2), [#allocation2], %s794_s14 }
  0x28   : > { %1016 = dma.done.wait (%p1130_p6), %s243_s23, 512  }
  0x29   : > { %1018 = vsyncadd (%p1130_p6), %s243_s23, 4294966784  ;;  %p287_p9 = scmp.lt.s32.totalorder %s1108_s22, 1  ;;  %vm367_vm0 = vcmask 1040384   ;;  %v304_v1 = vld [vmem:[%s246_s25 + $0x18] sm:$0xff]  ;;  %v303_v2 = vld [vmem:[%s246_s25 + $0x10] sm:$0xff]  ;;  %v1053_v6 = vmov 0.0  }
  0x2a   : > { %324 = vmatpush.msra.mxu0 %v304_v1  ;;  %v302_v4 = vld [vmem:[%s246_s25 + $0x8] sm:$0xff]  ;;  %v301_v5 = vld [vmem:[%s246_s25] sm:$0xff]  ;;  %v334_v8 = vmul.f32 %v303_v2, %v303_v2  ;;  %v335_v14 = vmul.f32 %v304_v1, %v304_v1  ;;  %vm308_vm2 = vcmask 261120   ;;  %s1054_s15 = smov 1.0   ;;  %v1218_v43 = vmov 0.0   ;;  %s1222_s26 = smov 0  }
  0x2b   : > { %s1183_s13 = scalar_select %p287_p9, %s1108_s22, 1  ;;  %v333_v9 = vmul.f32 %v302_v4, %v302_v4  ;;  %v332_v10 = vmul.f32 %v301_v5, %v301_v5  ;;  %v1220_v44 = vmov 0.0  }
  0x2c   : > { %325 = vmatpush.msra.mxu0 %v303_v2 }
  0x2d   : > { %s293_s17 = scalar_lea.vmem %s1305_s2, %s1183_s13  ;;  %s300_s28 = scalar_lea.vmem %s1308_s5, %s1183_s13  ;;  %v336_v15 = vadd.f32 %v333_v9, %v332_v10 }
  0x2e   : > { %s795_s9 = sshll.u32 %s1183_s13, 3  ;;  %v306_v0 = vld [vmem:[%s293_s17] sm:$0x1]  ;;  %326 = vmatpush.msra.mxu0 %v302_v4  ;;  %s281_s17 = scalar_lea.vmem [#allocation5], %s1173_s12 }
  0x2f   : > { %s297_s7 = scalar_lea.vmem %s1306_s3, %s795_s9  ;;  %vm354_vm1 = vcmp.gt.f32.partialorder %v306_v0, 0.0  ;;  %v357_v3 = vadd.f32 1e-08, %v306_v0  ;;  %s290_s23 = scalar_lea.vmem %s1304_s1, %s795_s9  ;;  %v337_v19 = vadd.f32 %v336_v15, %v334_v8 }
  0x30   : > { %v1201_v7 = vsel %vm354_vm1, 1.0, %v1053_v6  ;;  %v307_v11 = vld [vmem:[%s297_s7] sm:$0xff]  ;;  %327 = vmatpush.msra.mxu0 %v301_v5 }
  0x31   : > { %v1204_v12 = vsel %vm354_vm1, %v357_v3, 0.0  ;;  %885 = vlog2.f32 %v357_v3  ;;  %v368_v13 = vsel %vm367_vm0, %v1201_v7, 0.0  ;;  %v305_v16 = vld [vmem:[%s290_s23] sm:$0xff]  ;;  %v363_v17 = vadd.f32 1e-08, %v307_v11 }
  0x32   : > { %369 = vadd.xlane.f32.xlu0 %v368_v13  ;;  %v345_v18 = vmul.f32 %v305_v16, %v305_v16  ;;  %v338_v20 = vadd.f32 %v337_v19, %v335_v14  ;;  %797 = vmatmul.msk.f32.vlgmr.msra.gmra.mxu0 %vm308_vm2, %v305_v16  ;;  %vm362_vm3 = vcmp.gt.f32.partialorder %v307_v11, 0.0 }
  0x33   : > { %887 = vlog2.f32 %v363_v17 }
  0x34   : > { %v346_v22 = vsel %vm308_vm2, %v345_v18, 0.0  ;;  %v339_v28 = vrot.slane %v338_v20, 4 }
  0x36   : > { %v340_v29 = vadd.f32 %v339_v28, %v338_v20 }
  0x37   : > { %v886_v21 = vpop.eup %885 }
  0x38   : > { %v360_v23 = vmul.f32 0.6931472, %v886_v21  ;;  %v341_v31 = vrot.slane %v340_v29, 2 }
  0x39   : > { %v888_v24 = vpop.eup %887 }
  0x3a   : > { %v1209_v25 = vsel %vm354_vm1, %v360_v23, -1e+09  ;;  %347 = vadd.xlane.f32.xlu0 %v346_v22  ;;  %v365_v26 = vmul.f32 0.6931472, %v888_v24  ;;  %v342_v33 = vadd.f32 %v341_v31, %v340_v29 }
  0x3c   : > { %v1211_v27 = vsel %vm362_vm3, %v365_v26, -1e+09  ;;  %v343_v34 = vrot.slane %v342_v33, 1 }
  0x3e   : > { %v344_v35 = vadd.f32 %v343_v34, %v342_v33 }
  0xa5   : > { %v370_v30 = vpop.xlane.xlu0 %369 }
  0xa6   : > { %vm371_vm4 = vcmp.gt.f32.partialorder %v370_v30, 0.0 }
  0xa7   : > { %v799_v32 = vsel %vm371_vm4, 1.0, %v1053_v6 }
  0xa8   : > { %803 = vpush %v799_v32 }
  0xad   : > { %v348_v38 = vpop.xlane.xlu0 %347 }
  0xaf   : > { %v329_v36 = vpop.f32.mrf.mxu0 }
  0xb0   : > { %v349_v37 = vmul.f32 2.0, %v329_v36 }
  0xb2   : > { %v350_v39 = vsub.f32 %v349_v37, %v344_v35 }
  0xb4   : > { %v351_v40 = vsub.f32 %v350_v39, %v348_v38 }
  0xb6   : > { %v352_v41 = vmul.f32 10.0, %v351_v40 }
  0xb8   : > { %v1213_v42 = vmin.f32 %v352_v41, 0.0 }
  0xd9   : > { %s804_s25 = spop %803 }
  0xda   : > { %s1215_s16 = smax.f32 %s1054_s15, %s804_s25 }
  0xdb LB: >> { %v1055_v45 = vmov 0   ;;  %v389_v46 = vperm.slane %v1045_v44, 0  ;;  %s591_s8 = sadd.s32 4, %s1049_s26   ;;  %s1049_s26 = sphi %s1222_s26, %s1316_s26   ;;  %v1045_v44 = vphi %v1220_v44, %v1315_v44   ;;  %v1041_v43 = vphi %v1218_v43, %v1314_v43  }
  0xdc   : >> { %889 = vset.pattern.permute.xlu0 %v1055_v45  ;;  %890 = vset.pattern.permute.xlu1 %v1055_v45  ;;  %p382_p6 = scmp.lt.s32.totalorder %s591_s8, 100  ;;  %s1316_s26 = smov %s591_s8 }
  0xdd   : >> { %394 = vperm.xlu0 %889, %v1041_v43   ;;  %891 = vset.pattern.permute.xlu2 %v1055_v45  ;;  %v391_v47 = vadd.f32 %v389_v46, %v1213_v42 }
 0x14f   : >> { %v395_v48 = vpop.permute.xlu0 %394 }
 0x150   : >> { %v397_v49 = vadd.f32 %v395_v48, %v391_v47 }
 0x152   : >> { %v398_v50 = vrot.slane %v397_v49, 4 }
 0x154   : >> { %v399_v51 = vmax.f32 %v397_v49, %v398_v50 }
 0x156   : >> { %v400_v52 = vrot.slane %v399_v51, 2 }
 0x158   : >> { %v401_v53 = vmax.f32 %v399_v51, %v400_v52 }
 0x15a   : >> { %v402_v54 = vrot.slane %v401_v53, 1 }
 0x15c   : >> { %v403_v55 = vmax.f32 %v401_v53, %v402_v54 }
 0x15e   : >> { %v404_v56 = vsub.f32 %v397_v49, %v403_v55 }
 0x160   : >> { %v405_v57 = vmul.f32 1.442695, %v404_v56 }
 0x162   : >> { %892 = vpow2.f32 %v405_v57 }
 0x168   : >> { %v893_v58 = vpop.eup %892 }
 0x169   : >> { %v407_v59 = vrot.slane %v893_v58, 4 }
 0x16b   : >> { %v408_v60 = vadd.f32 %v893_v58, %v407_v59 }
 0x16d   : >> { %v409_v61 = vrot.slane %v408_v60, 2 }
 0x16f   : >> { %v410_v62 = vadd.f32 %v409_v61, %v408_v60 }
 0x171   : >> { %v411_v63 = vrot.slane %v410_v62, 1 }
 0x173   : >> { %v412_v0 = vadd.f32 %v411_v63, %v410_v62 }
 0x175   : >> { %894 = vrcp.f32 %v412_v0 }
 0x176   : >> { %896 = vlog2.f32 %v412_v0 }
 0x17b   : >> { %v895_v1 = vpop.eup %894 }
 0x17c   : >> { %v897_v2 = vpop.eup %896  ;;  %v419_v3 = vmul.f32 %v895_v1, %v1204_v12 }
 0x17d   : >> { %v414_v4 = vmul.f32 0.6931472, %v897_v2 }
 0x17e   : >> { %v421_v5 = vperm.slane %v419_v3, 0 }
 0x17f   : >> { %v415_v6 = vadd.f32 %v414_v4, %v403_v55 }
 0x180   : >> { %v423_v8 = vmul.f32 %v893_v58, %v421_v5 }
 0x181   : >> { %v416_v16 = vsub.f32 %v1209_v25, %v415_v6 }
 0x182   : >> { %424 = vadd.xlane.f32.xlu0 %v423_v8 }
 0x183   : >> { %v417_v17 = vadd.f32 %v1045_v44, %v416_v16 }
 0x185   : >> { %v432_v18 = vperm.slane %v417_v17, 0 }
 0x187   : >> { %v434_v19 = vadd.f32 %v432_v18, %v1213_v42 }
 0x1f5   : >> { %v425_v9 = vpop.xlane.xlu0 %424 }
 0x1f6   : >> { %v426_v10 = vmax.f32 %v425_v9, 1e-35 }
 0x1f8   : >> { %898 = vlog2.f32 %v426_v10 }
 0x1fe   : >> { %v899_v11 = vpop.eup %898 }
 0x1ff   : >> { %v428_v13 = vmul.f32 0.6931472, %v899_v11 }
 0x201   : >> { %v429_v14 = vsub.f32 %v1211_v27, %v428_v13 }
 0x203   : >> { %v430_v15 = vadd.f32 %v1041_v43, %v429_v14 }
 0x205   : >> { %437 = vperm.xlu1 %890, %v430_v15  }
 0x277   : >> { %v438_v20 = vpop.permute.xlu1 %437 }
 0x278   : >> { %v440_v21 = vadd.f32 %v438_v20, %v434_v19 }
 0x27a   : >> { %v441_v22 = vrot.slane %v440_v21, 4 }
 0x27c   : >> { %v442_v23 = vmax.f32 %v440_v21, %v441_v22 }
 0x27e   : >> { %v443_v24 = vrot.slane %v442_v23, 2 }
 0x280   : >> { %v444_v26 = vmax.f32 %v442_v23, %v443_v24 }
 0x282   : >> { %v445_v28 = vrot.slane %v444_v26, 1 }
 0x284   : >> { %v446_v29 = vmax.f32 %v444_v26, %v445_v28 }
 0x286   : >> { %v447_v30 = vsub.f32 %v440_v21, %v446_v29 }
 0x288   : >> { %v448_v31 = vmul.f32 1.442695, %v447_v30 }
 0x28a   : >> { %900 = vpow2.f32 %v448_v31 }
 0x290   : >> { %v901_v32 = vpop.eup %900 }
 0x291   : >> { %v450_v33 = vrot.slane %v901_v32, 4 }
 0x293   : >> { %v451_v34 = vadd.f32 %v901_v32, %v450_v33 }
 0x295   : >> { %v452_v35 = vrot.slane %v451_v34, 2 }
 0x297   : >> { %v453_v36 = vadd.f32 %v452_v35, %v451_v34 }
 0x299   : >> { %v454_v37 = vrot.slane %v453_v36, 1 }
 0x29b   : >> { %v455_v38 = vadd.f32 %v454_v37, %v453_v36 }
 0x29d   : >> { %902 = vrcp.f32 %v455_v38 }
 0x29e   : >> { %904 = vlog2.f32 %v455_v38 }
 0x2a3   : >> { %v903_v39 = vpop.eup %902 }
 0x2a4   : >> { %v905_v40 = vpop.eup %904  ;;  %v462_v41 = vmul.f32 %v903_v39, %v1204_v12 }
 0x2a5   : >> { %v457_v43 = vmul.f32 0.6931472, %v905_v40 }
 0x2a6   : >> { %v464_v44 = vperm.slane %v462_v41, 0 }
 0x2a7   : >> { %v458_v45 = vadd.f32 %v457_v43, %v446_v29 }
 0x2a8   : >> { %v466_v46 = vmul.f32 %v901_v32, %v464_v44 }
 0x2a9   : >> { %v459_v53 = vsub.f32 %v1209_v25, %v458_v45 }
 0x2aa   : >> { %467 = vadd.xlane.f32.xlu1 %v466_v46 }
 0x2ab   : >> { %v460_v54 = vadd.f32 %v459_v53, %v417_v17 }
 0x2ad   : >> { %v475_v55 = vperm.slane %v460_v54, 0 }
 0x2af   : >> { %v477_v56 = vadd.f32 %v475_v55, %v1213_v42 }
 0x31d   : >> { %v468_v47 = vpop.xlane.xlu1 %467 }
 0x31e   : >> { %v469_v48 = vmax.f32 %v468_v47, 1e-35 }
 0x320   : >> { %906 = vlog2.f32 %v469_v48 }
 0x326   : >> { %v907_v49 = vpop.eup %906 }
 0x327   : >> { %v471_v50 = vmul.f32 0.6931472, %v907_v49 }
 0x329   : >> { %v472_v51 = vsub.f32 %v1211_v27, %v471_v50 }
 0x32b   : >> { %v473_v52 = vadd.f32 %v472_v51, %v430_v15 }
 0x32d   : >> { %480 = vperm.xlu2 %891, %v473_v52  }
 0x387   : >> { %v481_v57 = vpop.permute.xlu2 %480 }
 0x388   : >> { %v483_v58 = vadd.f32 %v481_v57, %v477_v56 }
 0x38a   : >> { %v484_v59 = vrot.slane %v483_v58, 4 }
 0x38c   : >> { %v485_v60 = vmax.f32 %v483_v58, %v484_v59 }
 0x38e   : >> { %v486_v61 = vrot.slane %v485_v60, 2 }
 0x390   : >> { %v487_v62 = vmax.f32 %v485_v60, %v486_v61 }
 0x392   : >> { %v488_v63 = vrot.slane %v487_v62, 1 }
 0x394   : >> { %v489_v0 = vmax.f32 %v487_v62, %v488_v63  ;;  %v574_v62 = vstv %s1215_s16 }
 0x395   : >> { %vm580_vm5 = vweird.f32 %v574_v62 }
 0x396   : >> { %v490_v1 = vsub.f32 %v483_v58, %v489_v0 }
 0x398   : >> { %v491_v2 = vmul.f32 1.442695, %v490_v1 }
 0x39a   : >> { %908 = vpow2.f32 %v491_v2 }
 0x3a0   : >> { %v909_v3 = vpop.eup %908 }
 0x3a1   : >> { %v493_v4 = vrot.slane %v909_v3, 4 }
 0x3a3   : >> { %v494_v5 = vadd.f32 %v909_v3, %v493_v4 }
 0x3a5   : >> { %v495_v6 = vrot.slane %v494_v5, 2 }
 0x3a7   : >> { %v496_v8 = vadd.f32 %v495_v6, %v494_v5 }
 0x3a9   : >> { %v497_v9 = vrot.slane %v496_v8, 1 }
 0x3ab   : >> { %v498_v10 = vadd.f32 %v497_v9, %v496_v8 }
 0x3ad   : >> { %910 = vlog2.f32 %v498_v10 }
 0x3ae   : >> { %912 = vrcp.f32 %v498_v10 }
 0x3b3   : >> { %v911_v11 = vpop.eup %910 }
 0x3b4   : >> { %v913_v13 = vpop.eup %912  ;;  %v500_v14 = vmul.f32 0.6931472, %v911_v11 }
 0x3b5   : >> { %v505_v15 = vmul.f32 %v913_v13, %v1204_v12  ;;  %v586_v13 = vand.u32 2147483648, %v574_v62 }
 0x3b6   : >> { %v501_v16 = vadd.f32 %v500_v14, %v489_v0 }
 0x3b7   : >> { %v507_v17 = vperm.slane %v505_v15, 0 }
 0x3b8   : >> { %v502_v26 = vsub.f32 %v1209_v25, %v501_v16  ;;  %v584_v16 = vand.u32 2147483647, %v574_v62 }
 0x3b9   : >> { %v509_v18 = vmul.f32 %v909_v3, %v507_v17 }
 0x3ba   : >> { %v503_v28 = vadd.f32 %v502_v26, %v460_v54  ;;  %vm585_vm8 = vcmp.eq.f32.partialorder %v584_v16, 8.507059e+37 }
 0x3bb   : >> { %510 = vadd.xlane.f32.xlu2 %v509_v18 }
 0x3bc   : >> { %v518_v29 = vperm.slane %v503_v28, 0 }
 0x3be   : >> { %v520_v30 = vadd.f32 %v518_v29, %v1213_v42 }
 0x42e   : >> { %v511_v19 = vpop.xlane.xlu2 %510 }
 0x42f   : >> { %v512_v20 = vmax.f32 %v511_v19, 1e-35  ;;  %v587_v19 = vor.u32 1.1754944e-38, %v586_v13 }
 0x431   : >> { %914 = vlog2.f32 %v512_v20 }
 0x437   : >> { %v915_v21 = vpop.eup %914 }
 0x438   : >> { %v514_v22 = vmul.f32 0.6931472, %v915_v21 }
 0x43a   : >> { %v515_v23 = vsub.f32 %v1211_v27, %v514_v22 }
 0x43c   : >> { %v516_v24 = vadd.f32 %v515_v23, %v473_v52 }
 0x43e   : >> { %523 = vperm.xlu2 %891, %v516_v24  }
 0x498   : >> { %v524_v31 = vpop.permute.xlu2 %523 }
 0x499   : >> { %v526_v32 = vadd.f32 %v524_v31, %v520_v30 }
 0x49b   : >> { %v527_v33 = vrot.slane %v526_v32, 4 }
 0x49d   : >> { %v528_v34 = vmax.f32 %v526_v32, %v527_v33 }
 0x49f   : >> { %v529_v35 = vrot.slane %v528_v34, 2 }
 0x4a1   : >> { %v530_v36 = vmax.f32 %v528_v34, %v529_v35 }
 0x4a3   : >> { %v531_v37 = vrot.slane %v530_v36, 1 }
 0x4a5   : >> { %v532_v38 = vmax.f32 %v530_v36, %v531_v37 }
 0x4a7   : >> { %v533_v39 = vsub.f32 %v526_v32, %v532_v38 }
 0x4a9   : >> { %v534_v40 = vmul.f32 1.442695, %v533_v39 }
 0x4ab   : >> { %916 = vpow2.f32 %v534_v40 }
 0x4b1   : >> { %v917_v41 = vpop.eup %916 }
 0x4b2   : >> { %v536_v43 = vrot.slane %v917_v41, 4 }
 0x4b4   : >> { %v537_v44 = vadd.f32 %v917_v41, %v536_v43 }
 0x4b6   : >> { %v538_v45 = vrot.slane %v537_v44, 2 }
 0x4b8   : >> { %v539_v46 = vadd.f32 %v538_v45, %v537_v44 }
 0x4ba   : >> { %v540_v47 = vrot.slane %v539_v46, 1 }
 0x4bc   : >> { %v541_v48 = vadd.f32 %v540_v47, %v539_v46 }
 0x4be   : >> { %918 = vrcp.f32 %v541_v48 }
 0x4bf   : >> { %920 = vlog2.f32 %v541_v48 }
 0x4c0   : >> { %922 = vrcp.f32 %v574_v62 }
 0x4c4   : >> { %v919_v49 = vpop.eup %918 }
 0x4c5   : >> { %v921_v50 = vpop.eup %920  ;;  %v548_v51 = vmul.f32 %v919_v49, %v1204_v12 }
 0x4c6   : >> { %v543_v52 = vmul.f32 0.6931472, %v921_v50  ;;  %v923_v63 = vpop.eup %922 }
 0x4c7   : >> { %v550_v53 = vperm.slane %v548_v51, 0  ;;  %v576_v2 = vmul.f32 %v923_v63, %v574_v62  ;;  %vm581_vm6 = vweird.f32 %v923_v63 }
 0x4c8   : >> { %v544_v54 = vadd.f32 %v543_v52, %v532_v38  ;;  %vm582_vm7 = vmor %vm580_vm5, %vm581_vm6 }
 0x4c9   : >> { %v552_v55 = vmul.f32 %v917_v41, %v550_v53  ;;  %v577_v3 = vsub.f32 1.0, %v576_v2 }
 0x4ca   : >> { %v545_v56 = vsub.f32 %v1209_v25, %v544_v54 }
 0x4cb   : >> { %553 = vadd.xlane.f32.xlu1 %v552_v55  ;;  %v578_v8 = vmul.f32 %v923_v63, %v577_v3 }
 0x4cc   : >> { %v546_v57 = vadd.f32 %v545_v56, %v503_v28  }
 0x4cd   : >> { %v579_v15 = vadd.f32 %v923_v63, %v578_v8 }
 0x4ce   : >> { %v560_v58 = vsub.f32 %v546_v57, %v503_v28  ;;  %v1315_v44 = vmov %v546_v57 }
 0x4cf   : >> { %v583_v20 = vsel %vm582_vm7, %v923_v63, %v579_v15 }
 0x4d0   : >> { %v561_v59 = vand.u32 2147483647, %v560_v58  ;;  %v588_v23 = vsel %vm585_vm8, %v587_v19, %v583_v20 }
 0x4d2   : >> { %v562_v60 = vmul.f32 %v1201_v7, %v561_v59 }
 0x4d4   : >> { %v563_v61 = vsel %vm367_vm0, %v562_v60, 0.0 }
 0x4d5   : >> { %564 = vadd.xlane.f32.xlu0 %v563_v61 }
 0x53e   : >> { %v554_v0 = vpop.xlane.xlu1 %553 }
 0x53f   : >> { %v555_v1 = vmax.f32 %v554_v0, 1e-35 }
 0x541   : >> { %924 = vlog2.f32 %v555_v1 }
 0x547   : >> { %v925_v4 = vpop.eup %924 }
 0x548   : >> { %v557_v5 = vmul.f32 0.6931472, %v925_v4  ;;  %v565_v6 = vpop.xlane.xlu0 %564 }
 0x549   : >> { %v566_v9 = vrot.slane %v565_v6, 4 }
 0x54a   : >> { %v558_v10 = vsub.f32 %v1211_v27, %v557_v5 }
 0x54b   : >> { %v567_v11 = vadd.f32 %v566_v9, %v565_v6 }
 0x54c   : >> { %v559_v14 = vadd.f32 %v558_v10, %v516_v24  }
 0x54d   : >> { %v568_v17 = vrot.slane %v567_v11, 2 }
 0x54e   : >> { %v1314_v43 = vmov %v559_v14 }
 0x54f   : >> { %v569_v18 = vadd.f32 %v568_v17, %v567_v11 }
 0x551   : >> { %v570_v21 = vrot.slane %v569_v18, 1 }
 0x553   : >> { %v571_v22 = vadd.f32 %v570_v21, %v569_v18 }
 0x555   : >> { %805 = vpush %v571_v22 }
 0x556   : >> { %807 = vpush %v588_v23 }
 0x586   : >> { %s806_s9 = spop %805 }
 0x587   : >> { %s573_s10 = smul.f32 0.1, %s806_s9  ;;  %s808_s29 = spop %807 }
 0x589   : >> { %s590_s7 = smul.f32 %s808_s29, %s573_s10 }
 0x58b   : >> { %p383_p13 = scmp.ge.f32.partialorder %s590_s7, 0.1 }
 0x58d   : >> { %p384_p0 = pnand %p383_p13, %p382_p6 }
 0x58e   : > { %v1056_v24 = vmov (%p384_p0), 0   ;;  %v593_v26 = vperm.slane (%p384_p0), %v546_v57, 0  ;;  %v622_v37 = vlaneseq (%p384_p0)  ;;  %s648_s23 = scalar_lea.hbm (%p384_p0), %s1307_s4, %s1108_s22  ;;  %s650_s25 = sshll.u32 (%p384_p0), %s281_s17, 4  ;;  %s651_s25 = int_to_ptr.vmem [resolvable:$true] %s650_s25 }
 0x58f   : > { %387 = sbr.rel (!%p384_p0) target bundleno = 219 (0xdb), region = 109  ;;  %926 = vset.pattern.permute.xlu0 (%p384_p0), %v1056_v24  ;;  %s652_s15 = sshll.u32 (%p384_p0), %s648_s23, 4  ;;  %s653_s15 = int_to_ptr.hbm [resolvable:$true] %s652_s15 }
 0x590   : > { %598 = vperm.xlu0 (%p384_p0), %926, %v559_v14   ;;  %v595_v28 = vadd.f32 (%p384_p0), %v593_v26, %v1213_v42  ;;  %v623_v25 = vshrl.u32 (%p384_p0), %v622_v37, 7  ;;  %s637_s16 = scalar_lea.sflag (%p384_p0), [#allocation4], %s1173_s12  ;;  %s973_s26 = sshra.s32 (%p384_p0), %s653_s15, 4  ;;  %s974_s26 = int_to_ptr.hbm [resolvable:$true] %s973_s26 }
 0x591   : > { %s975_s8 = scalar_lea.hbm (%p384_p0), %s974_s26, 1  ;;  %s979_s10 = scalar_lea.hbm (%p384_p0), %s1307_s4, 2 }
 0x592   : > { %p976_p1 = scmp.ne.s32.totalorder (%p384_p0), %s974_s26, %s975_s8  ;;  %p980_p7 = scmp.lt.s32.totalorder (%p384_p0), %s974_s26, %s1307_s4 }
 0x593   : > { %p981_p5 = scmp.lt.s32.totalorder (%p384_p0), %s979_s10, %s975_s8 }
 0x594   : > { %p977_p3 = pnand %p976_p1, %p1137_p11 }
 0x595   : > { %p982_p8 = por %p981_p5, %p980_p7 }
 0x596   : > { %p978_p4 = pneg %p977_p3 }
 0x598   : > { %p983_p10 = pnand %p982_p8, %p978_p4 }
 0x602   : > { %v599_v29 = vpop.permute.xlu0 %598 }
 0x603   : > { %v601_v30 = vadd.f32 %v599_v29, %v595_v28 }
 0x605   : > { %v602_v31 = vmul.f32 1.442695, %v601_v30 }
 0x607   : > { %927 = vpow2.f32 %v602_v31 }
 0x60d   : > { %v928_v32 = vpop.eup %927 }
 0x60e   : > { %v604_v33 = vmul.f32 %v928_v32, %v1213_v42  ;;  %v616_v34 = vrot.slane %v928_v32, 4 }
 0x610   : > { %605 = vadd.xlane.f32.xlu0 %v604_v33  ;;  %v617_v35 = vmax.f32 %v928_v32, %v616_v34 }
 0x612   : > { %v618_v36 = vrot.slane %v617_v35, 2 }
 0x614   : > { %v619_v7 = vmax.f32 %v617_v35, %v618_v36 }
 0x616   : > { %v620_v12 = vrot.slane %v619_v7, 1 }
 0x618   : > { %v621_v27 = vmax.f32 %v619_v7, %v620_v12 }
 0x61a   : > { %vm624_vm9 = vcmp.ge.f32.partialorder %v928_v32, %v621_v27 }
 0x61b   : > { %v625_v38 = vsel %vm624_vm9, %v623_v25, 8 }
 0x61c   : > { %v626_v39 = vrot.slane %v625_v38, 4 }
 0x61e   : > { %vm627_vm10 = vcmp.lt.s32.totalorder %v625_v38, %v626_v39 }
 0x61f   : > { %v628_v40 = vsel %vm627_vm10, %v625_v38, %v626_v39 }
 0x620   : > { %v629_v41 = vrot.slane %v628_v40, 2 }
 0x622   : > { %vm630_vm11 = vcmp.lt.s32.totalorder %v628_v40, %v629_v41 }
 0x623   : > { %v631_v42 = vsel %vm630_vm11, %v628_v40, %v629_v41 }
 0x624   : > { %v632_v43 = vrot.slane %v631_v42, 1 }
 0x626   : > { %vm633_vm12 = vcmp.lt.s32.totalorder %v631_v42, %v632_v43 }
 0x627   : > { %v634_v44 = vsel %vm633_vm12, %v631_v42, %v632_v43 }
 0x628   : > { %635 = vst [vmem:[%s281_s17] sm:$0x1] %v634_v44 }
 0x629   : > { %986 = shalt.err (!%p983_p10)
}
 0x62a   : > { %811 = dma.vmem_to_hbm [thread:$0]  (%p1137_p11), %s651_s25, 16, %s653_s15, %s637_s16   ;;  %vm614_vm13 = vcmask 0  }
 0x683   : > { %v606_v45 = vpop.xlane.xlu0 %605 }
 0x684   : > { %v607_v46 = vrot.slane %v606_v45, 4 }
 0x686   : > { %v608_v47 = vadd.f32 %v607_v46, %v606_v45 }
 0x688   : > { %v609_v48 = vrot.slane %v608_v47, 2 }
 0x68a   : > { %v610_v49 = vadd.f32 %v609_v48, %v608_v47 }
 0x68c   : > { %v611_v50 = vrot.slane %v610_v49, 1 }
 0x68e   : > { %v612_v51 = vadd.f32 %v611_v50, %v610_v49 }
 0x690   : > { %v613_v52 = vmul.f32 -0.1, %v612_v51 }
 0x692   : > { %615 = vst.msk [vmem:[%s300_s28] sm:$0x1] %vm614_vm13, %v613_v52 }
 0x693 PF: > { %s667_s30 = sand.u32 1, %s1025_s18   ;;  %p1317_p11 = scmp.ge.s32.totalorder %s1037_s21, 2 }
 0x694   : > { %s668_s11 = scalar_lea.sflag [#allocation4], %s667_s30 }
 0x695   : > { %p818_p2 = pnand %p1317_p11, %p1141_p12 }
 0x697   : > { %p819_p9 = pneg %p818_p2 }
 0x699   : > { %1020 = dma.done.wait (%p819_p9), %s668_s11, 16  }
 0x69a   : > { %1022 = vsyncadd (%p819_p9), %s668_s11, 4294967280  ;;  %p19_p6 = scmp.ge.s32.totalorder %s1112_s24, 4   ;;  %s1318_s18 = smov %s1029_s19 }
 0x69b   : > { %s1319_s19 = smov %s1033_s20  ;;  %s1320_s20 = smov %s1124_s27 }
 0x69c   : > { %s1321_s21 = smov %s1112_s24  ;;  %21 = sbr.rel (!%p19_p6) target bundleno = 5 (0x5), region = 120 }
 0x6a1   :  { %679 = vsyncpa [#allocation3], 1 }
 0x6a2   :  { %681 = vsyncpa [#allocation3 + $0x1], 1 }
 0x6a3   :  { %682 = vsyncpa [#allocation4], 1 }
 0x6a4   :  { %684 = vsyncpa [#allocation4 + $0x1], 1 }

</bundles_post_ra>
